<compile_context>
chip_gen: v7x
topology: tpu7x:2x2x1
jax: 0.10.0
libtpu: 0.0.40
codegen_flags: <defaults>
</compile_context>

<pallas_src>
import jax
import jax.numpy as jnp
import numpy as np
from jax.experimental import pallas as pl
from jax.experimental.pallas import tpu as pltpu


def sage_fused_kernel(a_ref, x_ref, w_ref, o_ref):
    a = a_ref[...]            # (N, N)  f32 row-normalized adjacency
    x = x_ref[...]            # (N, P)  f32, cols = [features | 1 | zero pad]
    w_s1 = w_ref[0]           # (P, P)  self  weights layer 1 (+ bias row, + "1" passthrough col)
    w_n1 = w_ref[1]           # (P, P)  neigh weights layer 1
    w_s2 = w_ref[2]           # (P, P)  self  weights layer 2 (+ bias row)
    w_n2 = w_ref[3]           # (P, P)  neigh weights layer 2

    # ---- layer 1: mean-aggregate, then two separate projections ----
    agg1 = jnp.dot(a, x, preferred_element_type=jnp.float32)                 # (N, P)
    h1 = (jnp.dot(x, w_s1, preferred_element_type=jnp.float32)
          + jnp.dot(agg1, w_n1, preferred_element_type=jnp.float32))
    h1 = jnp.maximum(h1, 0.0)          # relu; passthrough column stays exactly 1

    # ---- layer 2: project first (O < H), then aggregate the neigh projection ----
    self_p = jnp.dot(h1, w_s2, preferred_element_type=jnp.float32)           # (N, P)
    neigh_p = jnp.dot(h1, w_n2, preferred_element_type=jnp.float32)          # (N, P)
    agg2 = jnp.dot(a, neigh_p, preferred_element_type=jnp.float32)           # (N, P)
    o_ref[...] = (self_p + agg2).astype(o_ref.dtype)


def sage_forward(a, x, params):
    """Fused two-layer SAGE forward in a single (grid-less) pallas_call."""
    N, F = x.shape
    H = params["w_self1"].shape[1]
    O = params["w_self2"].shape[1]
    P = 128  # common padded lane width (lane-dense stores; all dims <= 127 here)
    assert F + 1 <= P and H + 1 <= P and O <= P

    f32 = jnp.float32
    a = a.astype(f32)

    # x augmented with a constant-1 column (bias feed), zero-padded to P lanes.
    x_aug = jnp.zeros((N, P), f32).at[:, :F].set(x.astype(f32)).at[:, F].set(1.0)

    # layer-1 weights: bias folded into the self path; an extra output column
    # (index H) passes the constant 1 through relu into h1 for the layer-2 bias.
    w_s1 = jnp.zeros((P, P), f32)
    w_s1 = w_s1.at[:F, :H].set(params["w_self1"].astype(f32))
    w_s1 = w_s1.at[F, :H].set(params["b1"].reshape(-1).astype(f32))
    w_s1 = w_s1.at[F, H].set(1.0)
    w_n1 = jnp.zeros((P, P), f32).at[:F, :H].set(params["w_neigh1"].astype(f32))

    # layer-2 weights: bias folded into the self path via h1's "1" column.
    w_s2 = jnp.zeros((P, P), f32)
    w_s2 = w_s2.at[:H, :O].set(params["w_self2"].astype(f32))
    w_s2 = w_s2.at[H, :O].set(params["b2"].reshape(-1).astype(f32))
    w_n2 = jnp.zeros((P, P), f32).at[:H, :O].set(params["w_neigh2"].astype(f32))

    w_stack = jnp.stack([w_s1, w_n1, w_s2, w_n2], axis=0)     # (4, P, P)

    flops = 2 * N * (2 * N * P + 4 * P * P)                    # 6 matmuls
    bytes_accessed = 4 * (N * N + N * P + 4 * P * P + N * P)   # f32 operands + output

    vmem_spec = pl.BlockSpec(memory_space=pltpu.MemorySpace.VMEM)
    out = pl.pallas_call(
        sage_fused_kernel,
        out_shape=jax.ShapeDtypeStruct((N, P), f32),
        in_specs=[vmem_spec, vmem_spec, vmem_spec],
        out_specs=vmem_spec,
        cost_estimate=pl.CostEstimate(
            flops=flops, transcendentals=0, bytes_accessed=bytes_accessed),
    )(a, x_aug, w_stack)
    return out[:, :O]


def build_mean_adjacency(num_nodes, edges_src, edges_dst):
    """Dense row-normalized adjacency mimicking DGL copy_u + mean reduce."""
    adj = np.zeros((num_nodes, num_nodes), dtype=np.float32)
    for s, d in zip(edges_src, edges_dst):
        adj[d, s] += 1.0  # row = dst (aggregating node), col = src
    in_deg = adj.sum(axis=1, keepdims=True)
    norm = np.where(in_deg > 0, 1.0 / np.maximum(in_deg, 1.0), 0.0)
    return adj * norm


if __name__ == "__main__":
    # ---- synthetic "gene" graph, built exactly like the reference script ----
    num_nodes = 32
    gene_list = [f"gene_{i}" for i in range(num_nodes)]
    gene_dict = {gene: idx for idx, gene in enumerate(gene_list)}
    raw_edges = [(gene_list[i], gene_list[(i + 1) % num_nodes]) for i in range(num_nodes)]
    raw_edges += [(gene_list[i], gene_list[(i + 7) % num_nodes]) for i in range(0, num_nodes, 3)]
    # symmetrize, as in the reference (edges added in both directions)
    src_nodes = [gene_dict[e[0]] for e in raw_edges] + [gene_dict[e[1]] for e in raw_edges]
    dst_nodes = [gene_dict[e[1]] for e in raw_edges] + [gene_dict[e[0]] for e in raw_edges]
    A = jnp.asarray(build_mean_adjacency(num_nodes, src_nodes, dst_nodes))

    # ---- model dimensions ----
    in_feats, hid_feats, out_feats = 16, 32, 8

    key = jax.random.PRNGKey(0)
    kx, k1, k2, k3, k4, kb1, kb2 = jax.random.split(key, 7)

    inputs = jax.random.normal(kx, (num_nodes, in_feats), dtype=jnp.float32)

    def linear_init(k, fan_in, fan_out):
        # stored as (in, out) so the kernel does x @ W
        bound = 1.0 / np.sqrt(fan_in)
        return jax.random.uniform(k, (fan_in, fan_out), jnp.float32, -bound, bound)

    params = {
        "w_self1": linear_init(k1, in_feats, hid_feats),
        "w_neigh1": linear_init(k2, in_feats, hid_feats),
        "b1": 0.1 * jax.random.normal(kb1, (hid_feats,), jnp.float32),   # non-zero: exercises bias path
        "w_self2": linear_init(k3, hid_feats, out_feats),
        "w_neigh2": linear_init(k4, hid_feats, out_feats),
        "b2": 0.1 * jax.random.normal(kb2, (out_feats,), jnp.float32),
    }

    out = jax.jit(sage_forward)(A, inputs, params)
    jax.block_until_ready(out)

    # ---- sanity check against a plain-JAX f32 reference ----
    agg1 = A @ inputs
    h = jnp.maximum(inputs @ params["w_self1"] + agg1 @ params["w_neigh1"] + params["b1"], 0.0)
    ref = h @ params["w_self2"] + (A @ h) @ params["w_neigh2"] + params["b2"]

    assert out.shape == (num_nodes, out_feats)
    max_err = float(jnp.max(jnp.abs(out - ref)))
    assert max_err < 1e-2, f"mismatch vs reference: max abs err {max_err}"

    print("KERNEL_OK")
</pallas_src>

<mosaic_0001>
module attributes {stable_mosaic.version = 11 : i64} {
  func.func @sage_fused_kernel(%arg0: memref<32x32xf32, #tpu.memory_space<vmem>>, %arg1: memref<32x128xf32, #tpu.memory_space<vmem>>, %arg2: memref<4x128x128xf32, #tpu.memory_space<vmem>>, %arg3: memref<32x128xf32, #tpu.memory_space<vmem>>) attributes {dimension_semantics = [], scalar_prefetch = 0 : i64, scratch_operands = 0 : i64, tpu.core_type = #tpu.core_type<tc>} {
    %c0 = arith.constant 0 : index
    %c0_0 = arith.constant 0 : index
    %0 = vector.load %arg0[%c0, %c0_0] : memref<32x32xf32, #tpu.memory_space<vmem>>, vector<32x32xf32>
    %c0_1 = arith.constant 0 : index
    %c0_2 = arith.constant 0 : index
    %1 = vector.load %arg1[%c0_1, %c0_2] : memref<32x128xf32, #tpu.memory_space<vmem>>, vector<32x128xf32>
    %c0_3 = arith.constant 0 : index
    %c0_4 = arith.constant 0 : index
    %c0_5 = arith.constant 0 : index
    %2 = vector.load %arg2[%c0_3, %c0_4, %c0_5] : memref<4x128x128xf32, #tpu.memory_space<vmem>>, vector<1x128x128xf32>
    %3 = vector.shape_cast %2 : vector<1x128x128xf32> to vector<128x128xf32>
    %c1 = arith.constant 1 : index
    %c0_6 = arith.constant 0 : index
    %c0_7 = arith.constant 0 : index
    %4 = vector.load %arg2[%c1, %c0_6, %c0_7] : memref<4x128x128xf32, #tpu.memory_space<vmem>>, vector<1x128x128xf32>
    %5 = vector.shape_cast %4 : vector<1x128x128xf32> to vector<128x128xf32>
    %c2 = arith.constant 2 : index
    %c0_8 = arith.constant 0 : index
    %c0_9 = arith.constant 0 : index
    %6 = vector.load %arg2[%c2, %c0_8, %c0_9] : memref<4x128x128xf32, #tpu.memory_space<vmem>>, vector<1x128x128xf32>
    %7 = vector.shape_cast %6 : vector<1x128x128xf32> to vector<128x128xf32>
    %c3 = arith.constant 3 : index
    %c0_10 = arith.constant 0 : index
    %c0_11 = arith.constant 0 : index
    %8 = vector.load %arg2[%c3, %c0_10, %c0_11] : memref<4x128x128xf32, #tpu.memory_space<vmem>>, vector<1x128x128xf32>
    %9 = vector.shape_cast %8 : vector<1x128x128xf32> to vector<128x128xf32>
    %cst = arith.constant dense<0.000000e+00> : vector<32x128xf32>
    %10 = tpu.matmul %0, %1, %cst {dimension_numbers = #tpu.dot_dimension_numbers<[1], [0], [0], [1], [0, 0, 1, 1], [], []>} : vector<32x32xf32>, vector<32x128xf32>, vector<32x128xf32> -> vector<32x128xf32>
    %cst_12 = arith.constant dense<0.000000e+00> : vector<32x128xf32>
    %11 = tpu.matmul %1, %3, %cst_12 {dimension_numbers = #tpu.dot_dimension_numbers<[1], [0], [0], [1], [0, 0, 1, 1], [], []>} : vector<32x128xf32>, vector<128x128xf32>, vector<32x128xf32> -> vector<32x128xf32>
    %cst_13 = arith.constant dense<0.000000e+00> : vector<32x128xf32>
    %12 = tpu.matmul %10, %5, %cst_13 {dimension_numbers = #tpu.dot_dimension_numbers<[1], [0], [0], [1], [0, 0, 1, 1], [], []>} : vector<32x128xf32>, vector<128x128xf32>, vector<32x128xf32> -> vector<32x128xf32>
    %13 = arith.addf %11, %12 : vector<32x128xf32>
    %cst_14 = arith.constant 0.000000e+00 : f32
    %14 = vector.broadcast %cst_14 : f32 to vector<32x128xf32>
    %15 = arith.maximumf %13, %14 : vector<32x128xf32>
    %cst_15 = arith.constant dense<0.000000e+00> : vector<32x128xf32>
    %16 = tpu.matmul %15, %7, %cst_15 {dimension_numbers = #tpu.dot_dimension_numbers<[1], [0], [0], [1], [0, 0, 1, 1], [], []>} : vector<32x128xf32>, vector<128x128xf32>, vector<32x128xf32> -> vector<32x128xf32>
    %cst_16 = arith.constant dense<0.000000e+00> : vector<32x128xf32>
    %17 = tpu.matmul %15, %9, %cst_16 {dimension_numbers = #tpu.dot_dimension_numbers<[1], [0], [0], [1], [0, 0, 1, 1], [], []>} : vector<32x128xf32>, vector<128x128xf32>, vector<32x128xf32> -> vector<32x128xf32>
    %cst_17 = arith.constant dense<0.000000e+00> : vector<32x128xf32>
    %18 = tpu.matmul %0, %17, %cst_17 {dimension_numbers = #tpu.dot_dimension_numbers<[1], [0], [0], [1], [0, 0, 1, 1], [], []>} : vector<32x32xf32>, vector<32x128xf32>, vector<32x128xf32> -> vector<32x128xf32>
    %19 = arith.addf %16, %18 : vector<32x128xf32>
    %c0_18 = arith.constant 0 : index
    %c0_19 = arith.constant 0 : index
    %20 = vector.load %arg3[%c0_18, %c0_19] : memref<32x128xf32, #tpu.memory_space<vmem>>, vector<32x128xf32>
    tpu.vector_store %arg3[%c0_18, %c0_19], %19 {strides = array<i32>} : memref<32x128xf32, #tpu.memory_space<vmem>>, vector<32x128xf32>,
    return
  }
}

</mosaic_0001>

<bundles_post_ra>
// kernel: sage_forward.1
= control target key start
LH: loop header
LB: loop body
LE: loop exit
PB: predicated region body
PF: predicated region fallthrough
CT: control target
= control target key end

     0   :  { %vm89_vm0 = vcmask 261120   ;;  %s1406_s1 = inlined_call_operand.vmem [shape: f32[32,128], index: 1, kind: input, shape index: {}]   ;;  %s1407_s0 = inlined_call_operand.vmem [shape: f32[32,32], index: 0, kind: input, shape index: {}]   ;;  %s1408_s2 = inlined_call_operand.vmem [shape: f32[4,128,128], index: 2, kind: input, shape index: {}]   ;;  %s1409_s3 = inlined_call_operand.vmem [shape: f32[32,128], index: 3, kind: output, shape index: {}]  }
   0x1   :  { %v1131_v0 = vld [vmem:[%s1406_s1] sm:$0xff]  ;;  %v1136_v1 = vld [vmem:[%s1406_s1 + $0x8] sm:$0xff]  ;;  %v1141_v2 = vld [vmem:[%s1406_s1 + $0x10] sm:$0xff] }
   0x2   :  { %v956_v3 = vpack.c.bf16 %v1136_v1, %v1131_v0  ;;  %v1148_v4 = vld [vmem:[%s1406_s1 + $0x18] sm:$0xff]  ;;  %v1153_v5 = vld [vmem:[%s1407_s0] sm:$0xff]  ;;  %v625_v8 = vld [vmem:[%s1408_s2 + $0x88] sm:$0xff] }
   0x3   :  { %v960_v6 = vpack.c.bf16 %v1148_v4, %v1141_v2  ;;  %784 = vmatprep.mubr.msk.f32.mxu1 %vm89_vm0, %v1153_v5  ;;  %v624_v7 = vld [vmem:[%s1408_s2 + $0x80] sm:$0xff]  ;;  %v626_v10 = vld [vmem:[%s1408_s2 + $0x90] sm:$0xff]  ;;  %v627_v11 = vld [vmem:[%s1408_s2 + $0x98] sm:$0xff] }
   0x4   :  { %957 = vmatprep.subr.bf16.mxu1 %v956_v3  ;;  %v964_v9 = vpack.c.bf16 %v625_v8, %v624_v7  ;;  %v1174_v12 = vld [vmem:[%s1407_s0 + $0x8] sm:$0xff]  ;;  %v1179_v13 = vld [vmem:[%s1407_s0 + $0x10] sm:$0xff]  ;;  %v968_v14 = vpack.c.bf16 %v627_v11, %v626_v10  ;;  %v628_v15 = vld [vmem:[%s1408_s2 + $0xa0] sm:$0xff] }
   0x5   :  { %959 = vmatpush3.bf16.msra.mxu1 %v956_v3  ;;  %v629_v16 = vld [vmem:[%s1408_s2 + $0xa8] sm:$0xff]  ;;  %v1194_v17 = vld [vmem:[%s1407_s0 + $0x18] sm:$0xff]  ;;  %v630_v19 = vld [vmem:[%s1408_s2 + $0xb0] sm:$0xff] }
   0x6   :  { %961 = vmatprep.subr.bf16.mxu1 %v960_v6  ;;  %v972_v18 = vpack.c.bf16 %v629_v16, %v628_v15  ;;  %v631_v20 = vld [vmem:[%s1408_s2 + $0xb8] sm:$0xff]  ;;  %v632_v22 = vld [vmem:[%s1408_s2 + $0xc0] sm:$0xff]  ;;  %v633_v23 = vld [vmem:[%s1408_s2 + $0xc8] sm:$0xff] }
   0x7   :  { %v976_v21 = vpack.c.bf16 %v631_v20, %v630_v19  ;;  %v980_v24 = vpack.c.bf16 %v633_v23, %v632_v22  ;;  %v634_v25 = vld [vmem:[%s1408_s2 + $0xd0] sm:$0xff]  ;;  %v635_v26 = vld [vmem:[%s1408_s2 + $0xd8] sm:$0xff]  ;;  %v636_v28 = vld [vmem:[%s1408_s2 + $0xe0] sm:$0xff] }
   0x8   :  { %v984_v27 = vpack.c.bf16 %v635_v26, %v634_v25  ;;  %v637_v29 = vld [vmem:[%s1408_s2 + $0xe8] sm:$0xff]  ;;  %v638_v31 = vld [vmem:[%s1408_s2 + $0xf0] sm:$0xff]  ;;  %v639_v32 = vld [vmem:[%s1408_s2 + $0xf8] sm:$0xff] }
   0x9   :  { %963 = vmatpush3.bf16.msra.mxu1 %v960_v6  ;;  %v988_v30 = vpack.c.bf16 %v637_v29, %v636_v28  ;;  %v992_v33 = vpack.c.bf16 %v639_v32, %v638_v31  ;;  %v22_v34 = vld [vmem:[%s1408_s2] sm:$0xff]  ;;  %v23_v35 = vld [vmem:[%s1408_s2 + $0x8] sm:$0xff]  ;;  %v658_v39 = vld [vmem:[%s1408_s2 + $0x190] sm:$0xff] }
   0xa   :  { %965 = vmatprep.subr.bf16.mxu1 %v964_v9  ;;  %v996_v36 = vpack.c.bf16 %v23_v35, %v22_v34  ;;  %v656_v37 = vld [vmem:[%s1408_s2 + $0x180] sm:$0xff]  ;;  %v657_v38 = vld [vmem:[%s1408_s2 + $0x188] sm:$0xff]  ;;  %v659_v41 = vld [vmem:[%s1408_s2 + $0x198] sm:$0xff] }
   0xb   :  { %v1028_v40 = vpack.c.bf16 %v657_v38, %v656_v37  ;;  %v1032_v42 = vpack.c.bf16 %v659_v41, %v658_v39  ;;  %v660_v43 = vld [vmem:[%s1408_s2 + $0x1a0] sm:$0xff]  ;;  %v661_v44 = vld [vmem:[%s1408_s2 + $0x1a8] sm:$0xff]  ;;  %v662_v46 = vld [vmem:[%s1408_s2 + $0x1b0] sm:$0xff] }
   0xc   :  { %785 = vmatmul.mubr.msk.f32.vlgmr.msra.gmra.mrb[0].mxu1 %vm89_vm0, %v1174_v12  ;;  %v1036_v45 = vpack.c.bf16 %v661_v44, %v660_v43  ;;  %v663_v47 = vld [vmem:[%s1408_s2 + $0x1b8] sm:$0xff]  ;;  %v664_v49 = vld [vmem:[%s1408_s2 + $0x1c0] sm:$0xff]  ;;  %v665_v50 = vld [vmem:[%s1408_s2 + $0x1c8] sm:$0xff] }
   0xd   :  { %787 = vmatprep.mubr.msk.f32.mxu1 %vm89_vm0, %v1179_v13  ;;  %967 = vmatpush3.bf16.msra.mxu1 %v964_v9  ;;  %v1040_v48 = vpack.c.bf16 %v663_v47, %v662_v46  ;;  %v1044_v51 = vpack.c.bf16 %v665_v50, %v664_v49  ;;  %v666_v52 = vld [vmem:[%s1408_s2 + $0x1d0] sm:$0xff]  ;;  %v667_v53 = vld [vmem:[%s1408_s2 + $0x1d8] sm:$0xff]  ;;  %v668_v55 = vld [vmem:[%s1408_s2 + $0x1e0] sm:$0xff] }
   0xe   :  { %969 = vmatprep.subr.bf16.mxu1 %v968_v14  ;;  %1029 = vmatprep.subr.bf16.mxu0 %v1028_v40  ;;  %v1048_v54 = vpack.c.bf16 %v667_v53, %v666_v52  ;;  %v669_v56 = vld [vmem:[%s1408_s2 + $0x1e8] sm:$0xff]  ;;  %v24_v58 = vld [vmem:[%s1408_s2 + $0x10] sm:$0xff]  ;;  %v25_v59 = vld [vmem:[%s1408_s2 + $0x18] sm:$0xff] }
   0xf   :  { %1031 = vmatpush3.bf16.msra.mxu0 %v1028_v40  ;;  %v1052_v57 = vpack.c.bf16 %v669_v56, %v668_v55  ;;  %v1000_v62 = vpack.c.bf16 %v25_v59, %v24_v58  ;;  %v26_v63 = vld [vmem:[%s1408_s2 + $0x20] sm:$0xff]  ;;  %v27_v3 = vld [vmem:[%s1408_s2 + $0x28] sm:$0xff]  ;;  %v28_v9 = vld [vmem:[%s1408_s2 + $0x30] sm:$0xff] }
  0x10   :  { %788 = vmatmul.mubr.msk.f32.gmra.mrb[2].mxu1 %vm89_vm0, %v1194_v17  ;;  %1033 = vmatprep.subr.bf16.mxu0 %v1032_v42  ;;  %v1004_v7 = vpack.c.bf16 %v27_v3, %v26_v63  ;;  %v29_v10 = vld [vmem:[%s1408_s2 + $0x38] sm:$0xff]  ;;  %v31_v15 = vld [vmem:[%s1408_s2 + $0x48] sm:$0xff]  ;;  %v34_v20 = vld [vmem:[%s1408_s2 + $0x60] sm:$0xff] }
  0x11   :  { %971 = vmatpush3.bf16.msra.mxu1 %v968_v14  ;;  %v1008_v11 = vpack.c.bf16 %v29_v10, %v28_v9  ;;  %v30_v14 = vld [vmem:[%s1408_s2 + $0x40] sm:$0xff]  ;;  %v36_v23 = vld [vmem:[%s1408_s2 + $0x70] sm:$0xff]  ;;  %v641_v38 = vld [vmem:[%s1408_s2 + $0x108] sm:$0xff] }
  0x12   :  { %973 = vmatprep.subr.bf16.mxu1 %v972_v18  ;;  %v1012_v16 = vpack.c.bf16 %v31_v15, %v30_v14  ;;  %v670_v26 = vld [vmem:[%s1408_s2 + $0x1f0] sm:$0xff]  ;;  %v640_v37 = vld [vmem:[%s1408_s2 + $0x100] sm:$0xff]  ;;  %v643_v43 = vld [vmem:[%s1408_s2 + $0x118] sm:$0xff] }
  0x13   :  { %1035 = vmatpush3.bf16.msra.mxu0 %v1032_v42  ;;  %v1068_v42 = vpack.c.bf16 %v641_v38, %v640_v37  ;;  %v645_v46 = vld [vmem:[%s1408_s2 + $0x128] sm:$0xff]  ;;  %v647_v49 = vld [vmem:[%s1408_s2 + $0x138] sm:$0xff]  ;;  %v650_v52 = vld [vmem:[%s1408_s2 + $0x150] sm:$0xff] }
  0x14   :  { %1037 = vmatprep.subr.bf16.mxu0 %v1036_v45  ;;  %v649_v50 = vld [vmem:[%s1408_s2 + $0x148] sm:$0xff]  ;;  %v655_v58 = vld [vmem:[%s1408_s2 + $0x178] sm:$0xff] }
  0x15   :  { %975 = vmatpush3.bf16.msra.mxu1 %v972_v18  ;;  %v32_v18 = vld [vmem:[%s1408_s2 + $0x50] sm:$0xff]  ;;  %v653_v55 = vld [vmem:[%s1408_s2 + $0x168] sm:$0xff] }
  0x16   :  { %977 = vmatprep.subr.bf16.mxu1 %v976_v21 }
  0x17   :  { %1039 = vmatpush3.bf16.msra.mxu0 %v1036_v45  ;;  %v644_v45 = vld [vmem:[%s1408_s2 + $0x120] sm:$0xff] }
  0x18   :  { %1041 = vmatprep.subr.bf16.mxu0 %v1040_v48  ;;  %v1076_v47 = vpack.c.bf16 %v645_v46, %v644_v45 }
  0x19   :  { %979 = vmatpush3.bf16.msra.mxu1 %v976_v21  ;;  %v35_v21 = vld [vmem:[%s1408_s2 + $0x68] sm:$0xff] }
  0x1a   :  { %981 = vmatprep.subr.bf16.mxu1 %v980_v24  ;;  %v1020_v22 = vpack.c.bf16 %v35_v21, %v34_v20 }
  0x1b   :  { %1043 = vmatpush3.bf16.msra.mxu0 %v1040_v48  ;;  %v646_v48 = vld [vmem:[%s1408_s2 + $0x130] sm:$0xff] }
  0x1c   :  { %1045 = vmatprep.subr.bf16.mxu0 %v1044_v51 }
  0x1d   :  { %983 = vmatpush3.bf16.msra.mxu1 %v980_v24  ;;  %v37_v24 = vld [vmem:[%s1408_s2 + $0x78] sm:$0xff] }
  0x1e   :  { %985 = vmatprep.subr.bf16.mxu1 %v984_v27  ;;  %v1024_v25 = vpack.c.bf16 %v37_v24, %v36_v23 }
  0x1f   :  { %1047 = vmatpush3.bf16.msra.mxu0 %v1044_v51 }
  0x20   :  { %1049 = vmatprep.subr.bf16.mxu0 %v1048_v54 }
  0x21   :  { %987 = vmatpush3.bf16.msra.mxu1 %v984_v27  ;;  %v671_v27 = vld [vmem:[%s1408_s2 + $0x1f8] sm:$0xff] }
  0x22   :  { %989 = vmatprep.subr.bf16.mxu1 %v988_v30  ;;  %v1056_v28 = vpack.c.bf16 %v671_v27, %v670_v26 }
  0x23   :  { %1051 = vmatpush3.bf16.msra.mxu0 %v1048_v54  ;;  %v652_v54 = vld [vmem:[%s1408_s2 + $0x160] sm:$0xff] }
  0x24   :  { %1053 = vmatprep.subr.bf16.mxu0 %v1052_v57  ;;  %v1092_v56 = vpack.c.bf16 %v653_v55, %v652_v54 }
  0x25   :  { %991 = vmatpush3.bf16.msra.mxu1 %v988_v30 }
  0x26   :  { %993 = vmatprep.subr.bf16.mxu1 %v992_v33 }
  0x27   :  { %1055 = vmatpush3.bf16.msra.mxu0 %v1052_v57  ;;  %v654_v57 = vld [vmem:[%s1408_s2 + $0x170] sm:$0xff] }
  0x28   :  { %1057 = vmatprep.subr.bf16.mxu0 %v1056_v28  ;;  %v1096_v59 = vpack.c.bf16 %v655_v58, %v654_v57 }
  0x29   :  { %995 = vmatpush3.bf16.msra.mxu1 %v992_v33 }
  0x2a   :  { %997 = vmatprep.subr.bf16.mxu1 %v996_v36 }
  0x2b   :  { %1059 = vmatpush3.bf16.msra.mxu0 %v1056_v28 }
  0xdf   :  { %v786_v60 = vpop.f32.mrb[0].mxu1 }
  0xe0   :  { %v168_v61 = vpop.f32.mrb[1].mxu1 }
  0xe1   :  { %822 = vmatprep.mubr.f32.mxu1 %v168_v61 }
  0xe2   :  { %823 = vmatmul.mubr.f32.vlgmr.msra.gmra.mrb[4].mxu1 %v786_v60 }
  0xe3   :  { %999 = vmatpush3.bf16.msra.mxu1 %v996_v36  ;;  %v789_v6 = vpop.f32.mrb[2].mxu1 }
  0xe4   :  { %1001 = vmatprep.subr.bf16.mxu1 %v1000_v62  ;;  %v178_v8 = vpop.f32.mrb[3].mxu1 }
  0xe5   :  { %825 = vmatprep.mubr.f32.mxu1 %v178_v8 }
  0xe6   :  { %826 = vmatmul.mubr.f32.gmra.mrb[6].mxu1 %v789_v6 }
  0xe7   :  { %1003 = vmatpush3.bf16.msra.mxu1 %v1000_v62  ;;  %860 = vmatprep.mubr.f32.mxu1 %v1131_v0  ;;  %v33_v0 = vld [vmem:[%s1408_s2 + $0x58] sm:$0xff] }
  0xe8   :  { %1005 = vmatprep.subr.bf16.mxu1 %v1004_v7  ;;  %v1016_v19 = vpack.c.bf16 %v33_v0, %v32_v18 }
  0xeb   :  { %1007 = vmatpush3.bf16.msra.mxu1 %v1004_v7 }
  0xec   :  { %1009 = vmatprep.subr.bf16.mxu1 %v1008_v11 }
  0xef   :  { %1011 = vmatpush3.bf16.msra.mxu1 %v1008_v11 }
  0xf0   :  { %1013 = vmatprep.subr.bf16.mxu1 %v1012_v16 }
  0xf3   :  { %1015 = vmatpush3.bf16.msra.mxu1 %v1012_v16 }
  0xf4   :  { %1017 = vmatprep.subr.bf16.mxu1 %v1016_v19 }
  0xf7   :  { %1019 = vmatpush3.bf16.msra.mxu1 %v1016_v19 }
  0xf8   :  { %1021 = vmatprep.subr.bf16.mxu1 %v1020_v22 }
  0xfb   :  { %1023 = vmatpush3.bf16.msra.mxu1 %v1020_v22 }
  0xfc   :  { %1025 = vmatprep.subr.bf16.mxu1 %v1024_v25 }
  0xff   :  { %1027 = vmatpush3.bf16.msra.mxu1 %v1024_v25 }
 0x102   :  { %861 = vmatmul.mubr.f32.vlgmr.msra.gmra.mrb[4].mxu1 %v1136_v1 }
 0x103   :  { %863 = vmatprep.mubr.f32.mxu1 %v1141_v2 }
 0x106   :  { %864 = vmatmul.mubr.f32.gmra.mrb[6].mxu1 %v1148_v4 }
 0x1d5   :  { %v1328_v29 = vpop.f32.mrb[4].mxu1 }
 0x1d6   :  { %v338_v30 = vpop.f32.mrb[5].mxu1  ;;  %v358_v1 = vmax.f32 %v1328_v29, 0.0 }
 0x1d7   :  { %v357_v31 = vmax.f32 %v338_v30, 0.0 }
 0x1d9   :  { %v1331_v2 = vpop.f32.mrb[6].mxu1  ;;  %898 = vmatprep.mubr.f32.mxu0 %v357_v31 }
 0x1da   :  { %v348_v4 = vpop.f32.mrb[7].mxu1  ;;  %899 = vmatmul.mubr.f32.vlgmr.msra.gmra.mrb[0].mxu0 %v358_v1  ;;  %v360_v33 = vmax.f32 %v1331_v2, 0.0 }
 0x1db   :  { %v359_v32 = vmax.f32 %v348_v4, 0.0 }
 0x1dd   :  { %901 = vmatprep.mubr.f32.mxu0 %v359_v32 }
 0x1de   :  { %902 = vmatmul.mubr.f32.gmra.mrb[2].mxu0 %v360_v33 }
 0x1df   :  { %912 = vmatprep.mubr.msk.f32.mxu0 %vm89_vm0, %v1153_v5  ;;  %v642_v5 = vld [vmem:[%s1408_s2 + $0x110] sm:$0xff] }
 0x1e0   :  { %v1072_v44 = vpack.c.bf16 %v643_v43, %v642_v5 }
 0x2ad   :  { %v900_v34 = vpop.f32.mrb[0].mxu0 }
 0x2ae   :  { %v427_v35 = vpop.f32.mrb[1].mxu0 }
 0x2af   :  { %v1060_v36 = vpack.c.bf16 %v900_v34, %v427_v35 }
 0x2b1   :  { %v903_v39 = vpop.f32.mrb[2].mxu0  ;;  %1061 = vmatprep.subr.bf16.mxu0 %v1060_v36 }
 0x2b2   :  { %v437_v40 = vpop.f32.mrb[3].mxu0  ;;  %1063 = vmatpush3.bf16.msra.mxu0 %v1060_v36 }
 0x2b3   :  { %v1064_v41 = vpack.c.bf16 %v903_v39, %v437_v40 }
 0x2b5   :  { %1065 = vmatprep.subr.bf16.mxu0 %v1064_v41 }
 0x2b6   :  { %1067 = vmatpush3.bf16.msra.mxu0 %v1064_v41 }
 0x2b7   :  { %1069 = vmatprep.subr.bf16.mxu0 %v1068_v42 }
 0x2b9   :  { %913 = vmatmul.mubr.msk.f32.vlgmr.msra.gmra.mrb[4].mxu0 %vm89_vm0, %v1174_v12  ;;  %v1080_v12 = vpack.c.bf16 %v647_v49, %v646_v48 }
 0x2ba   :  { %1071 = vmatpush3.bf16.msra.mxu0 %v1068_v42  ;;  %915 = vmatprep.mubr.msk.f32.mxu0 %vm89_vm0, %v1179_v13  ;;  %v648_v13 = vld [vmem:[%s1408_s2 + $0x140] sm:$0xff] }
 0x2bb   :  { %1073 = vmatprep.subr.bf16.mxu0 %v1072_v44  ;;  %v1084_v51 = vpack.c.bf16 %v649_v50, %v648_v13 }
 0x2bd   :  { %916 = vmatmul.mubr.msk.f32.gmra.mrb[6].mxu0 %vm89_vm0, %v1194_v17  ;;  %v651_v17 = vld [vmem:[%s1408_s2 + $0x158] sm:$0xff] }
 0x2be   :  { %1075 = vmatpush3.bf16.msra.mxu0 %v1072_v44  ;;  %950 = vmatprep.mubr.f32.mxu0 %v357_v31  ;;  %v1088_v53 = vpack.c.bf16 %v651_v17, %v650_v52 }
 0x2bf   :  { %1077 = vmatprep.subr.bf16.mxu0 %v1076_v47 }
 0x2c2   :  { %1079 = vmatpush3.bf16.msra.mxu0 %v1076_v47 }
 0x2c3   :  { %1081 = vmatprep.subr.bf16.mxu0 %v1080_v12 }
 0x2c6   :  { %1083 = vmatpush3.bf16.msra.mxu0 %v1080_v12 }
 0x2c7   :  { %1085 = vmatprep.subr.bf16.mxu0 %v1084_v51 }
 0x2ca   :  { %1087 = vmatpush3.bf16.msra.mxu0 %v1084_v51 }
 0x2cb   :  { %1089 = vmatprep.subr.bf16.mxu0 %v1088_v53 }
 0x2ce   :  { %1091 = vmatpush3.bf16.msra.mxu0 %v1088_v53 }
 0x2cf   :  { %1093 = vmatprep.subr.bf16.mxu0 %v1092_v56 }
 0x2d2   :  { %1095 = vmatpush3.bf16.msra.mxu0 %v1092_v56 }
 0x2d3   :  { %1097 = vmatprep.subr.bf16.mxu0 %v1096_v59 }
 0x2d6   :  { %1099 = vmatpush3.bf16.msra.mxu0 %v1096_v59 }
 0x2d9   :  { %951 = vmatmul.mubr.f32.vlgmr.msra.gmra.mrb[4].mxu0 %v358_v1 }
 0x2da   :  { %953 = vmatprep.mubr.f32.mxu0 %v359_v32 }
 0x2dd   :  { %954 = vmatmul.mubr.f32.gmra.mrb[6].mxu0 %v360_v33 }
 0x3ac   :  { %v952_v60 = vpop.f32.mrb[4].mxu0 }
 0x3ad   :  { %617 = vst [vmem:[%s1409_s3 + $0x8] sm:$0xff] %v952_v60  ;;  %v597_v61 = vpop.f32.mrb[5].mxu0 }
 0x3ae   :  { %616 = vst [vmem:[%s1409_s3] sm:$0xff] %v597_v61 }
 0x3b0   :  { %v955_v62 = vpop.f32.mrb[6].mxu0 }
 0x3b1   :  { %619 = vst [vmem:[%s1409_s3 + $0x18] sm:$0xff] %v955_v62  ;;  %v607_v63 = vpop.f32.mrb[7].mxu0 }
 0x3b2   :  { %618 = vst [vmem:[%s1409_s3 + $0x10] sm:$0xff] %v607_v63 }

</bundles_post_ra>
